<compile_context>
chip_gen: v6e
topology: v6e:2x2x1
jax: 0.10.0
libtpu: 0.0.40
codegen_flags: <defaults>
</compile_context>

<pallas_src>
import functools

import jax
import jax.numpy as jnp
from jax import lax
from jax.experimental import pallas as pl
from jax.experimental.pallas import tpu as pltpu

LANE = 128


def _round_up(x, m):
    return (x + m - 1) // m * m


def _baseline_kernel(tok_ref, invlen_ref, emb_ref,
                     w1_ref, b1_ref, w2_ref, b2_ref, w3_ref, b3_ref,
                     out_ref, *, seq_len, vocab_p):
    # tok_ref    : (TB, S)   int32  token ids (0 = padding)
    # invlen_ref : (TB, 1)   f32    1 / length (padding rows: 1.0)
    # emb_ref    : (Vp, Ep)  f32    VMEM-resident embedding table (row 0 is zero)
    # w*_ref     : (in, out) f32    VMEM-resident, transposed, zero-padded Linear weights
    # b*_ref     : (1, out)  f32
    # out_ref    : (TB, Cp)  f32    lane-dense output slab
    tb = tok_ref.shape[0]
    tok = tok_ref[...]
    iota_v = lax.broadcasted_iota(jnp.int32, (tb, vocab_p), 1)

    # Token-count histogram over the padded vocab.  Padding tokens (id 0) count into
    # column 0, which multiplies the all-zero row 0 of the table, so the plain
    # counts @ table product equals the masked embedding sum of the reference model.
    counts = jnp.zeros((tb, vocab_p), jnp.float32)
    for s in range(seq_len):                       # static unroll, S compares + adds
        counts = counts + (tok[:, s:s + 1] == iota_v).astype(jnp.float32)

    # Mean pooling as an MXU matmul: (TB, Vp) @ (Vp, Ep), scaled by 1/length.
    pooled = jnp.dot(counts * invlen_ref[...], emb_ref[...],
                     preferred_element_type=jnp.float32)

    # Fused MLP (Dropout is identity at inference).
    h1 = jnp.dot(pooled, w1_ref[...], preferred_element_type=jnp.float32)
    h1 = jnp.maximum(h1 + b1_ref[...], 0.0)
    h2 = jnp.dot(h1, w2_ref[...], preferred_element_type=jnp.float32)
    h2 = jnp.maximum(h2 + b2_ref[...], 0.0)
    out = jnp.dot(h2, w3_ref[...], preferred_element_type=jnp.float32)
    out_ref[...] = out + b3_ref[...]


def prepare_params(params):
    """One-time layout prep (not per forward): transpose PyTorch (out,in) Linear
    weights to (in,out), zero-pad every feature dim to the 128-lane grid, and force
    the padding row (id 0) of the embedding table to zero."""
    emb = params["embedding"].astype(jnp.float32)
    V, E = emb.shape
    H = params["w1"].shape[0]
    C = params["w3"].shape[0]
    Vp, Ep = _round_up(V, LANE), _round_up(E, LANE)
    Hp, Cp = _round_up(H, LANE), _round_up(C, LANE)

    def pad2(w, r, c):
        return jnp.zeros((r, c), jnp.float32).at[:w.shape[0], :w.shape[1]].set(w)

    emb_p = pad2(emb, Vp, Ep).at[0].set(0.0)       # padding_idx=0 row exactly zero
    # TODO(synk): for vocabularies whose padded table exceeds the VMEM budget, add an
    # HBM-resident table path with coarse whole-tile DMA gathers (and/or bf16 storage).
    return {
        "emb": emb_p,
        "w1": pad2(params["w1"].T.astype(jnp.float32), Ep, Hp),
        "b1": pad2(params["b1"].astype(jnp.float32)[None, :], 1, Hp),
        "w2": pad2(params["w2"].T.astype(jnp.float32), Hp, Hp),
        "b2": pad2(params["b2"].astype(jnp.float32)[None, :], 1, Hp),
        "w3": pad2(params["w3"].T.astype(jnp.float32), Hp, Cp),
        "b3": pad2(params["b3"].astype(jnp.float32)[None, :], 1, Cp),
        "dims": (V, E, H, C, Vp, Ep, Hp, Cp),
    }


def _vmem_budget_bytes():
    # Generation-aware budget (~40% of physical VMEM); fallback is safe on
    # v5e/v6e (128 MiB physical) and v7x (64 MiB physical).
    try:
        cap = getattr(pltpu.get_tpu_info(), "vmem_capacity_bytes", None)
        if cap:
            return int(cap * 0.40)
    except Exception:
        pass
    return 26 * 1024 * 1024


def baseline_model_forward(x, lengths, prepped):
    """x: (B, S) int token ids; lengths: (B,) int; prepped: prepare_params output."""
    B, S = x.shape
    V, E, H, C, Vp, Ep, Hp, Cp = prepped["dims"]

    # Batch tiling: fill the MXU M dimension (up to 128 rows) while keeping at least
    # 2 grid steps so the "parallel" axis can be sharded across v7x's two TensorCores.
    Bp = _round_up(B, 16)
    block_b = min(128, Bp // 2)
    Bp = _round_up(Bp, block_b)
    grid = Bp // block_b

    tok = jnp.zeros((Bp, S), jnp.int32).at[:B].set(x.astype(jnp.int32))
    # Exact reciprocal computed once in the wrapper (0-length guard; reference would NaN).
    inv_len = jnp.ones((Bp, 1), jnp.float32).at[:B, 0].set(
        1.0 / jnp.maximum(lengths.astype(jnp.float32), 1.0))

    # VMEM residency check: table + weights + (double-buffered) per-step blocks.
    resident = 4 * (Vp * Ep + Ep * Hp + Hp * Hp + Hp * Cp + 2 * Hp + Cp)
    per_step = 4 * block_b * (S + 1 + Cp)
    vmem_need = 2 * (resident + per_step) + (2 << 20)
    budget = _vmem_budget_bytes()
    if vmem_need > budget:
        raise ValueError(
            f"Embedding table + weights ({vmem_need} B) exceed VMEM budget ({budget} B); "
            "use the HBM-gather path (TODO) or a bf16 table.")
    vmem_limit = min(max(vmem_need, 16 << 20), budget)

    flops = 2 * Bp * (Vp * Ep + Ep * Hp + Hp * Hp + Hp * Cp)
    bytes_accessed = 4 * (Vp * Ep + Ep * Hp + Hp * Hp + Hp * Cp
                          + Bp * S + Bp + Bp * Cp)

    const2 = lambda i: (0, 0)
    rowmap = lambda i: (i, 0)

    out = pl.pallas_call(
        functools.partial(_baseline_kernel, seq_len=S, vocab_p=Vp),
        out_shape=jax.ShapeDtypeStruct((Bp, Cp), jnp.float32),
        grid_spec=pltpu.PrefetchScalarGridSpec(
            num_scalar_prefetch=0,
            grid=(grid,),
            in_specs=[
                pl.BlockSpec((block_b, S), rowmap),   # token ids
                pl.BlockSpec((block_b, 1), rowmap),   # 1 / length
                pl.BlockSpec((Vp, Ep), const2),       # embedding table (VMEM-resident)
                pl.BlockSpec((Ep, Hp), const2),       # w1
                pl.BlockSpec((1, Hp), const2),        # b1
                pl.BlockSpec((Hp, Hp), const2),       # w2
                pl.BlockSpec((1, Hp), const2),        # b2
                pl.BlockSpec((Hp, Cp), const2),       # w3
                pl.BlockSpec((1, Cp), const2),        # b3
            ],
            out_specs=pl.BlockSpec((block_b, Cp), rowmap),
        ),
        compiler_params=pltpu.CompilerParams(
            dimension_semantics=("parallel",),        # batch tiles are independent
            vmem_limit_bytes=vmem_limit,
        ),
        cost_estimate=pl.CostEstimate(flops=flops, transcendentals=0,
                                      bytes_accessed=bytes_accessed),
    )(tok, inv_len, prepped["emb"],
      prepped["w1"], prepped["b1"], prepped["w2"], prepped["b2"],
      prepped["w3"], prepped["b3"])

    # Slice away batch padding and the lane padding of the class dim.
    return out[:B, :C]


def init_params(key, vocab_size, embedding_dim, hidden_dim, num_classes):
    ks = jax.random.split(key, 7)
    emb = jax.random.normal(ks[0], (vocab_size, embedding_dim), jnp.float32) * 0.1
    emb = emb.at[0].set(0.0)  # padding_idx=0
    return {
        "embedding": emb,
        "w1": jax.random.normal(ks[1], (hidden_dim, embedding_dim), jnp.float32) * 0.05,
        "b1": jax.random.normal(ks[2], (hidden_dim,), jnp.float32) * 0.01,
        "w2": jax.random.normal(ks[3], (hidden_dim, hidden_dim), jnp.float32) * 0.05,
        "b2": jax.random.normal(ks[4], (hidden_dim,), jnp.float32) * 0.01,
        "w3": jax.random.normal(ks[5], (num_classes, hidden_dim), jnp.float32) * 0.05,
        "b3": jax.random.normal(ks[6], (num_classes,), jnp.float32) * 0.01,
    }


if __name__ == "__main__":
    key = jax.random.PRNGKey(0)
    k_param, k_tok, k_len = jax.random.split(key, 3)

    # small shapes consistent with the module
    B, S = 16, 16
    VOCAB, EMB, HID, NCLS = 50, 32, 32, 1

    params = init_params(k_param, VOCAB, EMB, HID, NCLS)
    prepped = prepare_params(params)   # one-time transpose/pad (not per forward)

    # deterministic token ids with trailing padding (id 0)
    lengths = jax.random.randint(k_len, (B,), 4, S + 1, dtype=jnp.int32)
    tokens = jax.random.randint(k_tok, (B, S), 1, VOCAB, dtype=jnp.int32)
    seq_pos = jnp.arange(S)[None, :]
    tokens = jnp.where(seq_pos < lengths[:, None], tokens, 0)

    out = baseline_model_forward(tokens, lengths, prepped)
    out = jax.block_until_ready(out)

    # plain-JAX reference identical to the PyTorch forward (eval mode)
    emb = jnp.take(params["embedding"], tokens, axis=0)
    mask = (tokens != 0).astype(jnp.float32)[:, :, None]
    pooled = jnp.sum(emb * mask, axis=1) / lengths.astype(jnp.float32)[:, None]
    h = jnp.maximum(pooled @ params["w1"].T + params["b1"], 0.0)
    h = jnp.maximum(h @ params["w2"].T + params["b2"], 0.0)
    ref = h @ params["w3"].T + params["b3"]

    assert out.shape == (B, NCLS)
    assert jnp.allclose(out, ref, atol=1e-4, rtol=1e-4), (out, ref)
    print("KERNEL_OK")
</pallas_src>

<mosaic_0001>
module attributes {stable_mosaic.version = 11 : i64} {
  func.func @_baseline_kernel(%arg0: i32, %arg1: memref<8x16xi32, #tpu.memory_space<vmem>>, %arg2: memref<8x1xf32, #tpu.memory_space<vmem>>, %arg3: memref<128x128xf32, #tpu.memory_space<vmem>>, %arg4: memref<128x128xf32, #tpu.memory_space<vmem>>, %arg5: memref<1x128xf32, #tpu.memory_space<vmem>>, %arg6: memref<128x128xf32, #tpu.memory_space<vmem>>, %arg7: memref<1x128xf32, #tpu.memory_space<vmem>>, %arg8: memref<128x128xf32, #tpu.memory_space<vmem>>, %arg9: memref<1x128xf32, #tpu.memory_space<vmem>>, %arg10: memref<8x128xf32, #tpu.memory_space<vmem>>) attributes {dimension_semantics = [#tpu.dimension_semantics<parallel>], iteration_bounds = array<i64: 2>, scalar_prefetch = 0 : i64, scratch_operands = 0 : i64, tpu.core_type = #tpu.core_type<tc>, window_params = [{transform_indices = @transform_0, window_bounds = array<i64: 8, 16>}, {transform_indices = @transform_1, window_bounds = array<i64: 8, 1>}, {pipeline_mode = #tpu.pipeline_mode<synchronous>, transform_indices = @transform_2, window_bounds = array<i64: 128, 128>}, {pipeline_mode = #tpu.pipeline_mode<synchronous>, transform_indices = @transform_3, window_bounds = array<i64: 128, 128>}, {pipeline_mode = #tpu.pipeline_mode<synchronous>, transform_indices = @transform_4, window_bounds = array<i64: 1, 128>}, {pipeline_mode = #tpu.pipeline_mode<synchronous>, transform_indices = @transform_5, window_bounds = array<i64: 128, 128>}, {pipeline_mode = #tpu.pipeline_mode<synchronous>, transform_indices = @transform_6, window_bounds = array<i64: 1, 128>}, {pipeline_mode = #tpu.pipeline_mode<synchronous>, transform_indices = @transform_7, window_bounds = array<i64: 128, 128>}, {pipeline_mode = #tpu.pipeline_mode<synchronous>, transform_indices = @transform_8, window_bounds = array<i64: 1, 128>}, {transform_indices = @transform_9, window_bounds = array<i64: 8, 128>}]} {
    %c0 = arith.constant 0 : index
    %c0_0 = arith.constant 0 : index
    %0 = vector.load %arg1[%c0, %c0_0] : memref<8x16xi32, #tpu.memory_space<vmem>>, vector<8x16xi32>
    %1 = tpu.iota {dimensions = array<i32: 1>} : vector<8x128xi32>
    %cst = arith.constant 0.000000e+00 : f32
    %2 = vector.broadcast %cst : f32 to vector<8x128xf32>
    %3 = vector.extract_strided_slice %0 {offsets = [0, 0], sizes = [8, 1], strides = [1, 1]} : vector<8x16xi32> to vector<8x1xi32>
    %4 = vector.broadcast %3 : vector<8x1xi32> to vector<8x128xi32>
    %5 = arith.cmpi eq, %4, %1 : vector<8x128xi32>
    %6 = arith.extui %5 : vector<8x128xi1> to vector<8x128xi32>
    %7 = arith.sitofp %6 : vector<8x128xi32> to vector<8x128xf32>
    %8 = arith.addf %2, %7 : vector<8x128xf32>
    %9 = vector.extract_strided_slice %0 {offsets = [0, 1], sizes = [8, 1], strides = [1, 1]} : vector<8x16xi32> to vector<8x1xi32>
    %10 = vector.broadcast %9 : vector<8x1xi32> to vector<8x128xi32>
    %11 = arith.cmpi eq, %10, %1 : vector<8x128xi32>
    %12 = arith.extui %11 : vector<8x128xi1> to vector<8x128xi32>
    %13 = arith.sitofp %12 : vector<8x128xi32> to vector<8x128xf32>
    %14 = arith.addf %8, %13 : vector<8x128xf32>
    %15 = vector.extract_strided_slice %0 {offsets = [0, 2], sizes = [8, 1], strides = [1, 1]} : vector<8x16xi32> to vector<8x1xi32>
    %16 = vector.broadcast %15 : vector<8x1xi32> to vector<8x128xi32>
    %17 = arith.cmpi eq, %16, %1 : vector<8x128xi32>
    %18 = arith.extui %17 : vector<8x128xi1> to vector<8x128xi32>
    %19 = arith.sitofp %18 : vector<8x128xi32> to vector<8x128xf32>
    %20 = arith.addf %14, %19 : vector<8x128xf32>
    %21 = vector.extract_strided_slice %0 {offsets = [0, 3], sizes = [8, 1], strides = [1, 1]} : vector<8x16xi32> to vector<8x1xi32>
    %22 = vector.broadcast %21 : vector<8x1xi32> to vector<8x128xi32>
    %23 = arith.cmpi eq, %22, %1 : vector<8x128xi32>
    %24 = arith.extui %23 : vector<8x128xi1> to vector<8x128xi32>
    %25 = arith.sitofp %24 : vector<8x128xi32> to vector<8x128xf32>
    %26 = arith.addf %20, %25 : vector<8x128xf32>
    %27 = vector.extract_strided_slice %0 {offsets = [0, 4], sizes = [8, 1], strides = [1, 1]} : vector<8x16xi32> to vector<8x1xi32>
    %28 = vector.broadcast %27 : vector<8x1xi32> to vector<8x128xi32>
    %29 = arith.cmpi eq, %28, %1 : vector<8x128xi32>
    %30 = arith.extui %29 : vector<8x128xi1> to vector<8x128xi32>
    %31 = arith.sitofp %30 : vector<8x128xi32> to vector<8x128xf32>
    %32 = arith.addf %26, %31 : vector<8x128xf32>
    %33 = vector.extract_strided_slice %0 {offsets = [0, 5], sizes = [8, 1], strides = [1, 1]} : vector<8x16xi32> to vector<8x1xi32>
    %34 = vector.broadcast %33 : vector<8x1xi32> to vector<8x128xi32>
    %35 = arith.cmpi eq, %34, %1 : vector<8x128xi32>
    %36 = arith.extui %35 : vector<8x128xi1> to vector<8x128xi32>
    %37 = arith.sitofp %36 : vector<8x128xi32> to vector<8x128xf32>
    %38 = arith.addf %32, %37 : vector<8x128xf32>
    %39 = vector.extract_strided_slice %0 {offsets = [0, 6], sizes = [8, 1], strides = [1, 1]} : vector<8x16xi32> to vector<8x1xi32>
    %40 = vector.broadcast %39 : vector<8x1xi32> to vector<8x128xi32>
    %41 = arith.cmpi eq, %40, %1 : vector<8x128xi32>
    %42 = arith.extui %41 : vector<8x128xi1> to vector<8x128xi32>
    %43 = arith.sitofp %42 : vector<8x128xi32> to vector<8x128xf32>
    %44 = arith.addf %38, %43 : vector<8x128xf32>
    %45 = vector.extract_strided_slice %0 {offsets = [0, 7], sizes = [8, 1], strides = [1, 1]} : vector<8x16xi32> to vector<8x1xi32>
    %46 = vector.broadcast %45 : vector<8x1xi32> to vector<8x128xi32>
    %47 = arith.cmpi eq, %46, %1 : vector<8x128xi32>
    %48 = arith.extui %47 : vector<8x128xi1> to vector<8x128xi32>
    %49 = arith.sitofp %48 : vector<8x128xi32> to vector<8x128xf32>
    %50 = arith.addf %44, %49 : vector<8x128xf32>
    %51 = vector.extract_strided_slice %0 {offsets = [0, 8], sizes = [8, 1], strides = [1, 1]} : vector<8x16xi32> to vector<8x1xi32>
    %52 = vector.broadcast %51 : vector<8x1xi32> to vector<8x128xi32>
    %53 = arith.cmpi eq, %52, %1 : vector<8x128xi32>
    %54 = arith.extui %53 : vector<8x128xi1> to vector<8x128xi32>
    %55 = arith.sitofp %54 : vector<8x128xi32> to vector<8x128xf32>
    %56 = arith.addf %50, %55 : vector<8x128xf32>
    %57 = vector.extract_strided_slice %0 {offsets = [0, 9], sizes = [8, 1], strides = [1, 1]} : vector<8x16xi32> to vector<8x1xi32>
    %58 = vector.broadcast %57 : vector<8x1xi32> to vector<8x128xi32>
    %59 = arith.cmpi eq, %58, %1 : vector<8x128xi32>
    %60 = arith.extui %59 : vector<8x128xi1> to vector<8x128xi32>
    %61 = arith.sitofp %60 : vector<8x128xi32> to vector<8x128xf32>
    %62 = arith.addf %56, %61 : vector<8x128xf32>
    %63 = vector.extract_strided_slice %0 {offsets = [0, 10], sizes = [8, 1], strides = [1, 1]} : vector<8x16xi32> to vector<8x1xi32>
    %64 = vector.broadcast %63 : vector<8x1xi32> to vector<8x128xi32>
    %65 = arith.cmpi eq, %64, %1 : vector<8x128xi32>
    %66 = arith.extui %65 : vector<8x128xi1> to vector<8x128xi32>
    %67 = arith.sitofp %66 : vector<8x128xi32> to vector<8x128xf32>
    %68 = arith.addf %62, %67 : vector<8x128xf32>
    %69 = vector.extract_strided_slice %0 {offsets = [0, 11], sizes = [8, 1], strides = [1, 1]} : vector<8x16xi32> to vector<8x1xi32>
    %70 = vector.broadcast %69 : vector<8x1xi32> to vector<8x128xi32>
    %71 = arith.cmpi eq, %70, %1 : vector<8x128xi32>
    %72 = arith.extui %71 : vector<8x128xi1> to vector<8x128xi32>
    %73 = arith.sitofp %72 : vector<8x128xi32> to vector<8x128xf32>
    %74 = arith.addf %68, %73 : vector<8x128xf32>
    %75 = vector.extract_strided_slice %0 {offsets = [0, 12], sizes = [8, 1], strides = [1, 1]} : vector<8x16xi32> to vector<8x1xi32>
    %76 = vector.broadcast %75 : vector<8x1xi32> to vector<8x128xi32>
    %77 = arith.cmpi eq, %76, %1 : vector<8x128xi32>
    %78 = arith.extui %77 : vector<8x128xi1> to vector<8x128xi32>
    %79 = arith.sitofp %78 : vector<8x128xi32> to vector<8x128xf32>
    %80 = arith.addf %74, %79 : vector<8x128xf32>
    %81 = vector.extract_strided_slice %0 {offsets = [0, 13], sizes = [8, 1], strides = [1, 1]} : vector<8x16xi32> to vector<8x1xi32>
    %82 = vector.broadcast %81 : vector<8x1xi32> to vector<8x128xi32>
    %83 = arith.cmpi eq, %82, %1 : vector<8x128xi32>
    %84 = arith.extui %83 : vector<8x128xi1> to vector<8x128xi32>
    %85 = arith.sitofp %84 : vector<8x128xi32> to vector<8x128xf32>
    %86 = arith.addf %80, %85 : vector<8x128xf32>
    %87 = vector.extract_strided_slice %0 {offsets = [0, 14], sizes = [8, 1], strides = [1, 1]} : vector<8x16xi32> to vector<8x1xi32>
    %88 = vector.broadcast %87 : vector<8x1xi32> to vector<8x128xi32>
    %89 = arith.cmpi eq, %88, %1 : vector<8x128xi32>
    %90 = arith.extui %89 : vector<8x128xi1> to vector<8x128xi32>
    %91 = arith.sitofp %90 : vector<8x128xi32> to vector<8x128xf32>
    %92 = arith.addf %86, %91 : vector<8x128xf32>
    %93 = vector.extract_strided_slice %0 {offsets = [0, 15], sizes = [8, 1], strides = [1, 1]} : vector<8x16xi32> to vector<8x1xi32>
    %94 = vector.broadcast %93 : vector<8x1xi32> to vector<8x128xi32>
    %95 = arith.cmpi eq, %94, %1 : vector<8x128xi32>
    %96 = arith.extui %95 : vector<8x128xi1> to vector<8x128xi32>
    %97 = arith.sitofp %96 : vector<8x128xi32> to vector<8x128xf32>
    %98 = arith.addf %92, %97 : vector<8x128xf32>
    %c0_1 = arith.constant 0 : index
    %c0_2 = arith.constant 0 : index
    %99 = vector.load %arg2[%c0_1, %c0_2] : memref<8x1xf32, #tpu.memory_space<vmem>>, vector<8x1xf32>
    %100 = vector.broadcast %99 : vector<8x1xf32> to vector<8x128xf32>
    %101 = arith.mulf %98, %100 : vector<8x128xf32>
    %c0_3 = arith.constant 0 : index
    %c0_4 = arith.constant 0 : index
    %102 = vector.load %arg3[%c0_3, %c0_4] : memref<128x128xf32, #tpu.memory_space<vmem>>, vector<128x128xf32>
    %cst_5 = arith.constant dense<0.000000e+00> : vector<8x128xf32>
    %103 = tpu.matmul %101, %102, %cst_5 {dimension_numbers = #tpu.dot_dimension_numbers<[1], [0], [0], [1], [0, 0, 1, 1], [], []>} : vector<8x128xf32>, vector<128x128xf32>, vector<8x128xf32> -> vector<8x128xf32>
    %c0_6 = arith.constant 0 : index
    %c0_7 = arith.constant 0 : index
    %104 = vector.load %arg4[%c0_6, %c0_7] : memref<128x128xf32, #tpu.memory_space<vmem>>, vector<128x128xf32>
    %cst_8 = arith.constant dense<0.000000e+00> : vector<8x128xf32>
    %105 = tpu.matmul %103, %104, %cst_8 {dimension_numbers = #tpu.dot_dimension_numbers<[1], [0], [0], [1], [0, 0, 1, 1], [], []>} : vector<8x128xf32>, vector<128x128xf32>, vector<8x128xf32> -> vector<8x128xf32>
    %c0_9 = arith.constant 0 : index
    %c0_10 = arith.constant 0 : index
    %106 = vector.load %arg5[%c0_9, %c0_10] : memref<1x128xf32, #tpu.memory_space<vmem>>, vector<1x128xf32>
    %107 = vector.broadcast %106 : vector<1x128xf32> to vector<8x128xf32>
    %108 = arith.addf %105, %107 : vector<8x128xf32>
    %cst_11 = arith.constant 0.000000e+00 : f32
    %109 = vector.broadcast %cst_11 : f32 to vector<8x128xf32>
    %110 = arith.maximumf %108, %109 : vector<8x128xf32>
    %c0_12 = arith.constant 0 : index
    %c0_13 = arith.constant 0 : index
    %111 = vector.load %arg6[%c0_12, %c0_13] : memref<128x128xf32, #tpu.memory_space<vmem>>, vector<128x128xf32>
    %cst_14 = arith.constant dense<0.000000e+00> : vector<8x128xf32>
    %112 = tpu.matmul %110, %111, %cst_14 {dimension_numbers = #tpu.dot_dimension_numbers<[1], [0], [0], [1], [0, 0, 1, 1], [], []>} : vector<8x128xf32>, vector<128x128xf32>, vector<8x128xf32> -> vector<8x128xf32>
    %c0_15 = arith.constant 0 : index
    %c0_16 = arith.constant 0 : index
    %113 = vector.load %arg7[%c0_15, %c0_16] : memref<1x128xf32, #tpu.memory_space<vmem>>, vector<1x128xf32>
    %114 = vector.broadcast %113 : vector<1x128xf32> to vector<8x128xf32>
    %115 = arith.addf %112, %114 : vector<8x128xf32>
    %cst_17 = arith.constant 0.000000e+00 : f32
    %116 = vector.broadcast %cst_17 : f32 to vector<8x128xf32>
    %117 = arith.maximumf %115, %116 : vector<8x128xf32>
    %c0_18 = arith.constant 0 : index
    %c0_19 = arith.constant 0 : index
    %118 = vector.load %arg8[%c0_18, %c0_19] : memref<128x128xf32, #tpu.memory_space<vmem>>, vector<128x128xf32>
    %cst_20 = arith.constant dense<0.000000e+00> : vector<8x128xf32>
    %119 = tpu.matmul %117, %118, %cst_20 {dimension_numbers = #tpu.dot_dimension_numbers<[1], [0], [0], [1], [0, 0, 1, 1], [], []>} : vector<8x128xf32>, vector<128x128xf32>, vector<8x128xf32> -> vector<8x128xf32>
    %c0_21 = arith.constant 0 : index
    %c0_22 = arith.constant 0 : index
    %120 = vector.load %arg9[%c0_21, %c0_22] : memref<1x128xf32, #tpu.memory_space<vmem>>, vector<1x128xf32>
    %121 = vector.broadcast %120 : vector<1x128xf32> to vector<8x128xf32>
    %122 = arith.addf %119, %121 : vector<8x128xf32>
    %c0_23 = arith.constant 0 : index
    %c0_24 = arith.constant 0 : index
    %123 = vector.load %arg10[%c0_23, %c0_24] : memref<8x128xf32, #tpu.memory_space<vmem>>, vector<8x128xf32>
    tpu.vector_store %arg10[%c0_23, %c0_24], %122 {strides = array<i32>} : memref<8x128xf32, #tpu.memory_space<vmem>>, vector<8x128xf32>,
    return
  }
  func.func @transform_0(%arg0: i32) -> (i32, i32) {
    %c0_i32 = arith.constant 0 : i32
    %c0_i32_0 = arith.constant 0 : i32
    return %arg0, %c0_i32 : i32, i32
  }
  func.func @transform_1(%arg0: i32) -> (i32, i32) {
    %c0_i32 = arith.constant 0 : i32
    %c0_i32_0 = arith.constant 0 : i32
    return %arg0, %c0_i32 : i32, i32
  }
  func.func @transform_2(%arg0: i32) -> (i32, i32) {
    %c0_i32 = arith.constant 0 : i32
    %c0_i32_0 = arith.constant 0 : i32
    %c0_i32_1 = arith.constant 0 : i32
    return %c0_i32, %c0_i32_0 : i32, i32
  }
  func.func @transform_3(%arg0: i32) -> (i32, i32) {
    %c0_i32 = arith.constant 0 : i32
    %c0_i32_0 = arith.constant 0 : i32
    %c0_i32_1 = arith.constant 0 : i32
    return %c0_i32, %c0_i32_0 : i32, i32
  }
  func.func @transform_4(%arg0: i32) -> (i32, i32) {
    %c0_i32 = arith.constant 0 : i32
    %c0_i32_0 = arith.constant 0 : i32
    %c0_i32_1 = arith.constant 0 : i32
    return %c0_i32, %c0_i32_0 : i32, i32
  }
  func.func @transform_5(%arg0: i32) -> (i32, i32) {
    %c0_i32 = arith.constant 0 : i32
    %c0_i32_0 = arith.constant 0 : i32
    %c0_i32_1 = arith.constant 0 : i32
    return %c0_i32, %c0_i32_0 : i32, i32
  }
  func.func @transform_6(%arg0: i32) -> (i32, i32) {
    %c0_i32 = arith.constant 0 : i32
    %c0_i32_0 = arith.constant 0 : i32
    %c0_i32_1 = arith.constant 0 : i32
    return %c0_i32, %c0_i32_0 : i32, i32
  }
  func.func @transform_7(%arg0: i32) -> (i32, i32) {
    %c0_i32 = arith.constant 0 : i32
    %c0_i32_0 = arith.constant 0 : i32
    %c0_i32_1 = arith.constant 0 : i32
    return %c0_i32, %c0_i32_0 : i32, i32
  }
  func.func @transform_8(%arg0: i32) -> (i32, i32) {
    %c0_i32 = arith.constant 0 : i32
    %c0_i32_0 = arith.constant 0 : i32
    %c0_i32_1 = arith.constant 0 : i32
    return %c0_i32, %c0_i32_0 : i32, i32
  }
  func.func @transform_9(%arg0: i32) -> (i32, i32) {
    %c0_i32 = arith.constant 0 : i32
    %c0_i32_0 = arith.constant 0 : i32
    return %arg0, %c0_i32 : i32, i32
  }
}

</mosaic_0001>

<bundles_post_ra>
// kernel: tpu_custom_call.1
= control target key start
LH: loop header
LB: loop body
LE: loop exit
PB: predicated region body
PF: predicated region fallthrough
CT: control target
= control target key end

     0   :  { %14 = vsyncpa [#allocation3], 0  ;;  %s1949_s0 = inlined_call_operand.vmem [shape: s32[16,16], index: 0, kind: input, shape index: {}]   ;;  %s1950_s1 = inlined_call_operand.vmem [shape: f32[16,1], index: 1, kind: input, shape index: {}]   ;;  %s1951_s2 = inlined_call_operand.hbm [shape: f32[128,128], index: 2, kind: input, shape index: {}]   ;;  %s1952_s3 = inlined_call_operand.hbm [shape: f32[128,128], index: 3, kind: input, shape index: {}]   ;;  %s1953_s4 = inlined_call_operand.vmem [shape: f32[1,128], index: 4, kind: input, shape index: {}]   ;;  %s1954_s5 = inlined_call_operand.hbm [shape: f32[128,128], index: 5, kind: input, shape index: {}]   ;;  %s1955_s6 = inlined_call_operand.vmem [shape: f32[1,128], index: 6, kind: input, shape index: {}]   ;;  %s1956_s7 = inlined_call_operand.hbm [shape: f32[128,128], index: 7, kind: input, shape index: {}]   ;;  %s1957_s8 = inlined_call_operand.vmem [shape: f32[1,128], index: 8, kind: input, shape index: {}]   ;;  %s1958_s9 = inlined_call_operand.hbm [shape: f32[16,128], index: 9, kind: output, shape index: {}]  }
   0x1   :  { %15 = vsyncpa [#allocation6], 0 }
   0x2   :  { %16 = vsyncpa [#allocation9], 0 }
   0x3   :  { %17 = vsyncpa [#allocation4], 0 }
   0x4   :  { %19 = vsyncpa [#allocation4 + $0x1], 0  ;;  %s1637_s30 = smov 0   ;;  %s1639_s10 = smov 0  }
   0x5   :  { %s1641_s11 = smov 0   ;;  %s1643_s12 = smov 0  }
   0x6 LB: > { %s1658_s13 = sadd.s32 4294967295, %s1560_s12   ;;  %s1020_s14 = sadd.s32 4294967294, %s1560_s12   ;;  %s1560_s12 = sphi %s1643_s12, %s1966_s12   ;;  %s1556_s11 = sphi %s1641_s11, %s1965_s11   ;;  %s1552_s10 = sphi %s1639_s10, %s1964_s10   ;;  %s1548_s30 = sphi %s1637_s30, %s1963_s30  }
   0x7   : > { %s1662_s15 = sadd.s32 1, %s1560_s12   ;;  %s231_s16 = sadd.s32 1, %s1556_s11 }
   0x8   : > { %s228_s17 = ssub.s32 %s1560_s12, %s1662_s15  ;;  %p241_p0 = scmp.ne.s32.totalorder %s1556_s11, %s1552_s10 }
   0x9   : > { %p229_p1 = scmp.eq.s32.totalorder %s228_s17, 0  ;;  %p242_p2 = scmp.eq.s32.totalorder %s1658_s13, 1 }
   0xa   : > { %p247_p3 = scmp.ne.s32.totalorder %s1552_s10, %s1548_s30  ;;  %p248_p4 = scmp.eq.s32.totalorder %s1020_s14, 1 }
   0xb   : > { %s1673_s18 = scalar_select %p229_p1, %s1556_s11, %s231_s16  }
   0xc   : > { %p1675_p5 = por %p242_p2, %p241_p0  ;;  %p1679_p6 = por %p248_p4, %p247_p3 }
   0xd   : > { %p1021_p7 = scmp.ge.s32.totalorder %s1560_s12, 1  ;;  %p255_p8 = scmp.lt.s32.totalorder %s1560_s12, 3 }
   0xe   : > { %p1301_p9 = scmp.eq.s32.totalorder %s1658_s13, 0  ;;  %s1562_s22 = smov [#allocation5]  }
   0xf   : > { %p1686_p10 = pnand %p1021_p7, %p255_p8  ;;  %s280_s23 = sshll.u32 %s1562_s22, 4  ;;  %s281_s23 = int_to_ptr.vmem [resolvable:$true] %s280_s23 }
  0x10   : > { %s1563_s25 = smov [#allocation2]   ;;  %s1564_s27 = smov [#allocation7]  }
  0x11   : > { %p1284_p11 = pneg %p1686_p10  ;;  %s267_s26 = sshll.u32 %s1563_s25, 4  ;;  %s268_s26 = int_to_ptr.vmem [resolvable:$true] %s267_s26 }
  0x12   : > { %s296_s28 = sshll.u32 %s1564_s27, 4  ;;  %s1395_s29 = scalar_lea.vmem %s281_s23, 2048  ;;  %s297_s28 = int_to_ptr.vmem [resolvable:$true] %s296_s28 }
  0x13   : > { %p1694_p12 = pnand %p1301_p9, %p1284_p11  ;;  %p1396_p0 = scmp.ne.s32.totalorder %s281_s23, %s1395_s29 }
  0x14   : > { %p1403_p3 = scmp.lt.s32.totalorder %s281_s23, %s281_s23  ;;  %p1404_p4 = scmp.lt.s32.totalorder %s1395_s29, %s1395_s29 }
  0x15   : > { %p1386_p13 = pneg %p1694_p12 }
  0x16   : > { %p1405_p7 = por %p1404_p4, %p1403_p3 }
  0x17   : > { %p1398_p1 = pnand %p1396_p0, %p1386_p13 }
  0x19   : > { %p1399_p2 = pneg %p1398_p1 }
  0x1b   : > { %p1406_p8 = pnand %p1405_p7, %p1399_p2 }
  0x1d   : > { %1409 = shalt.err (!%p1406_p8)
}
  0x1e   : > { %s1565_s14 = smov 128   ;;  %s1566_s16 = smov 8  }
  0x1f   : > { %1290 = dma.hbm_to_vmem [thread:$0]  (!%p1694_p12), %s1952_s3, 2048, %s281_s23, [#allocation6], %s1565_s14, %s1565_s14, %s1566_s16  }
  0x20   : > { %s1421_s25 = scalar_lea.vmem %s268_s26, 2048  ;;  %p1429_p2 = scmp.lt.s32.totalorder %s268_s26, %s268_s26 }
  0x21   : > { %p1422_p11 = scmp.ne.s32.totalorder %s268_s26, %s1421_s25  ;;  %p1430_p3 = scmp.lt.s32.totalorder %s1421_s25, %s1421_s25 }
  0x23   : > { %p1424_p0 = pnand %p1422_p11, %p1386_p13  ;;  %p1431_p4 = por %p1430_p3, %p1429_p2 }
  0x25   : > { %p1425_p1 = pneg %p1424_p0 }
  0x27   : > { %p1432_p7 = pnand %p1431_p4, %p1425_p1 }
  0x29   : > { %1435 = shalt.err (!%p1432_p7)
}
  0x2a   : > { %1287 = dma.hbm_to_vmem [thread:$0]  (!%p1694_p12), %s1951_s2, 2048, %s268_s26, [#allocation3], %s1565_s14, %s1565_s14, %s1566_s16  }
  0x2b   : > { %s1447_s23 = scalar_lea.vmem %s297_s28, 2048  ;;  %p1455_p2 = scmp.lt.s32.totalorder %s297_s28, %s297_s28 }
  0x2c   : > { %p1448_p8 = scmp.ne.s32.totalorder %s297_s28, %s1447_s23  ;;  %p1456_p1 = scmp.lt.s32.totalorder %s1447_s23, %s1447_s23 }
  0x2e   : > { %p1450_p11 = pnand %p1448_p8, %p1386_p13  ;;  %p1457_p3 = por %p1456_p1, %p1455_p2 }
  0x30   : > { %p1451_p0 = pneg %p1450_p11 }
  0x32   : > { %p1458_p4 = pnand %p1457_p3, %p1451_p0 }
  0x34   : > { %1461 = shalt.err (!%p1458_p4)
}
  0x35   : > { %1293 = dma.hbm_to_vmem [thread:$0]  (!%p1694_p12), %s1954_s5, 2048, %s297_s28, [#allocation6], %s1565_s14, %s1565_s14, %s1566_s16  }
  0x36   : > { %s1567_s26 = smov [#allocation8]  }
  0x37   : > { %s312_s25 = sshll.u32 %s1567_s26, 4  ;;  %s313_s25 = int_to_ptr.vmem [resolvable:$true] %s312_s25 }
  0x38   : > { %s1473_s27 = scalar_lea.vmem %s313_s25, 2048  ;;  %p1481_p0 = scmp.lt.s32.totalorder %s313_s25, %s313_s25 }
  0x39   : > { %p1474_p7 = scmp.ne.s32.totalorder %s313_s25, %s1473_s27  ;;  %p1482_p2 = scmp.lt.s32.totalorder %s1473_s27, %s1473_s27 }
  0x3b   : > { %p1476_p8 = pnand %p1474_p7, %p1386_p13  ;;  %p1483_p1 = por %p1482_p2, %p1481_p0 }
  0x3d   : > { %p1477_p11 = pneg %p1476_p8 }
  0x3f   : > { %p1484_p3 = pnand %p1483_p1, %p1477_p11 }
  0x41   : > { %1487 = shalt.err (!%p1484_p3)
}
  0x42   : > { %1296 = dma.hbm_to_vmem [thread:$0]  (!%p1694_p12), %s1956_s7, 2048, %s313_s25, [#allocation9], %s1565_s14, %s1565_s14, %s1566_s16  }
  0x43   : > { %345 = sbr.rel (%p1686_p10) target bundleno = 1055 (0x41f), region = 56 }
  0x48   : > { %1531 = dma.done.wait (%p1301_p9), [#allocation3], 2048  }
  0x49   : > { %1533 = vsyncadd (%p1301_p9), [#allocation3], 4294965248 }
  0x4a   : > { %1535 = dma.done.wait (%p1301_p9), [#allocation6], 4096  }
  0x4b   : > { %1537 = vsyncadd (%p1301_p9), [#allocation6], 4294963200 }
  0x4c   : > { %1539 = dma.done.wait (%p1301_p9), [#allocation9], 2048  }
  0x4d   : > { %1541 = vsyncadd (%p1301_p9), [#allocation9], 4294965248  ;;  %p396_p10 = scmp.lt.s32.totalorder %s1658_s13, 1  ;;  %v1568_v0 = vmov 2   ;;  %v1569_v1 = vmov 0   ;;  %v1570_v2 = vmov 0.0   ;;  %v405_v50 = vlaneseq }
  0x4e   : > { %1368 = vset.pattern.permute.xlu1 %v1568_v0  ;;  %1366 = vset.pattern.permute.xlu0 %v1569_v1  ;;  %v1571_v4 = vmov 3   ;;  %v1572_v5 = vmov 1   ;;  %v1573_v6 = vmov 4   ;;  %v1574_v7 = vmov 5   ;;  %v541_v10 = vld [vmem:[#allocation2 + $0x78] sm:$0xff]  ;;  %v540_v11 = vld [vmem:[#allocation2 + $0x70] sm:$0xff] }
  0x4f   : > { %s1761_s21 = scalar_select %p396_p10, %s1658_s13, 1  ;;  %1126 = vmatprep.subr.mxu0 %v1570_v2  ;;  %1161 = vmatprep.subr.mxu1 %v1570_v2  ;;  %v1575_v8 = vmov 6   ;;  %v1576_v9 = vmov 8   ;;  %v1577_v12 = vmov 7   ;;  %v1578_v13 = vmov 11   ;;  %v539_v14 = vld [vmem:[#allocation2 + $0x68] sm:$0xff] }
  0x50   : > { %1127 = vmatpush3.msra.mxu0 %v541_v10  ;;  %v1579_v15 = vmov 9   ;;  %v1580_v16 = vmov 14   ;;  %v538_v17 = vld [vmem:[#allocation2 + $0x60] sm:$0xff]  ;;  %v537_v18 = vld [vmem:[#allocation2 + $0x58] sm:$0xff]  ;;  %v536_v19 = vld [vmem:[#allocation2 + $0x50] sm:$0xff]  ;;  %v1581_v20 = vmov 10  }
  0x51   : > { %s1033_s24 = sshll.u32 %s1761_s21, 3  ;;  %1128 = vmatprep.subr.mxu0 %v1570_v2  ;;  %v535_v21 = vld [vmem:[#allocation2 + $0x48] sm:$0xff]  ;;  %v534_v22 = vld [vmem:[#allocation2 + $0x40] sm:$0xff]  ;;  %v1582_v23 = vmov 12   ;;  %v533_v24 = vld [vmem:[#allocation2 + $0x38] sm:$0xff]  ;;  %v1583_v27 = vmov 13  }
  0x52   : > { %s399_s23 = scalar_lea.vmem %s1949_s0, %s1033_s24  ;;  %1129 = vmatpush3.msra.mxu0 %v540_v11  ;;  %v532_v25 = vld [vmem:[#allocation2 + $0x30] sm:$0xff]  ;;  %v531_v26 = vld [vmem:[#allocation2 + $0x28] sm:$0xff]  ;;  %v530_v28 = vld [vmem:[#allocation2 + $0x20] sm:$0xff]  ;;  %v1584_v30 = vmov 15   ;;  %s403_s26 = scalar_lea.vmem %s1950_s1, %s1033_s24  ;;  %vm1585_vm0 = vmmov 0   ;;  %v1831_v51 = vand.u32 127, %v405_v50 }
  0x53   : > { %v1771_v3 = vld [vmem:[%s399_s23] sm:$0xff]  ;;  %1130 = vmatprep.subr.mxu0 %v1570_v2  ;;  %v529_v29 = vld [vmem:[#allocation2 + $0x18] sm:$0xff]  ;;  %v528_v31 = vld [vmem:[#allocation2 + $0x10] sm:$0xff]  ;;  %1158 = vmatprep.mubr.msk.f32.mxu0 %vm1585_vm0, %v1570_v2  ;;  %s393_s21 = sand.u32 1, %s1552_s10   ;;  %s1055_s23 = sshll.u32 %s1658_s13, 7 }
  0x54   : > { %422 = vperm.xlu1 %1368, %v1771_v3   ;;  %408 = vperm.xlu0 %1366, %v1771_v3   ;;  %v527_v32 = vld [vmem:[#allocation2 + $0x8] sm:$0xff]  ;;  %v519_v33 = vld [vmem:[%s403_s26] sm:$0xff]  ;;  %v627_v35 = vld [vmem:[#allocation5 + $0x78] sm:$0xff]  ;;  %s1032_s24 = sshll.u32 %s393_s21, 3  ;;  %s1914_s27 = scalar_lea.hbm %s1958_s9, %s1055_s23 }
  0x55   : > { %1131 = vmatpush3.msra.mxu0 %v539_v14  ;;  %v526_v34 = vld [vmem:[#allocation2] sm:$0xff]  ;;  %1193 = vmatprep.mubr.msk.f32.mxu1 %vm1585_vm0, %v1570_v2  ;;  %v626_v36 = vld [vmem:[#allocation5 + $0x70] sm:$0xff]  ;;  %v625_v37 = vld [vmem:[#allocation5 + $0x68] sm:$0xff]  ;;  %s395_s17 = scalar_lea.vmem [#allocation10], %s1032_s24  ;;  %s895_s28 = scalar_lea.sflag [#allocation4], %s393_s21 }
  0x56   : > { %1132 = vmatprep.subr.mxu0 %v1570_v2  ;;  %1162 = vmatpush3.msra.mxu1 %v627_v35  ;;  %v624_v38 = vld [vmem:[#allocation5 + $0x60] sm:$0xff]  ;;  %v623_v39 = vld [vmem:[#allocation5 + $0x58] sm:$0xff]  ;;  %v622_v40 = vld [vmem:[#allocation5 + $0x50] sm:$0xff]  ;;  %s908_s22 = sshll.u32 %s395_s17, 4  ;;  %s1586_s14 = smov [#allocation10]   ;;  %s909_s22 = int_to_ptr.vmem [resolvable:$true] %s908_s22 }
  0x57   : > { %1133 = vmatpush3.msra.mxu0 %v538_v17  ;;  %1163 = vmatprep.subr.mxu1 %v1570_v2  ;;  %v621_v41 = vld [vmem:[#allocation5 + $0x48] sm:$0xff]  ;;  %v620_v42 = vld [vmem:[#allocation5 + $0x40] sm:$0xff]  ;;  %v619_v43 = vld [vmem:[#allocation5 + $0x38] sm:$0xff]  ;;  %s1488_s29 = scalar_lea.vmem %s909_s22, 128  ;;  %s1492_s13 = sshll.u32 %s1586_s14, 4  ;;  %s1493_s13 = int_to_ptr.vmem [resolvable:$false] %s1492_s13 }
  0x58   : > { %1369 = vset.pattern.permute.xlu1 %v1571_v4  ;;  %1367 = vset.pattern.permute.xlu0 %v1572_v5  ;;  %v618_v44 = vld [vmem:[#allocation5 + $0x30] sm:$0xff]  ;;  %v617_v45 = vld [vmem:[#allocation5 + $0x28] sm:$0xff]  ;;  %v616_v46 = vld [vmem:[#allocation5 + $0x20] sm:$0xff]  ;;  %p1489_p9 = scmp.ne.s32.totalorder %s909_s22, %s1488_s29  ;;  %s1494_s24 = scalar_lea.vmem %s1493_s13, 256 }
  0x59   : > { %429 = vperm.xlu1 %1369, %v1771_v3   ;;  %415 = vperm.xlu0 %1367, %v1771_v3   ;;  %v615_v47 = vld [vmem:[#allocation5 + $0x18] sm:$0xff]  ;;  %v614_v48 = vld [vmem:[#allocation5 + $0x10] sm:$0xff]  ;;  %v613_v49 = vld [vmem:[#allocation5 + $0x8] sm:$0xff]  ;;  %p1495_p4 = scmp.lt.s32.totalorder %s909_s22, %s1493_s13  ;;  %p1496_p7 = scmp.lt.s32.totalorder %s1494_s24, %s1488_s29 }
  0x5a   : > { %1134 = vmatprep.subr.mxu0 %v1570_v2  ;;  %1164 = vmatpush3.msra.mxu1 %v626_v36  ;;  %v710_v50 = vld [vmem:[#allocation7 + $0x20] sm:$0xff]  ;;  %p1490_p12 = pnand %p1489_p9, %p1675_p5 }
  0x5b   : > { %1135 = vmatpush3.msra.mxu0 %v537_v18  ;;  %1165 = vmatprep.subr.mxu1 %v1570_v2  ;;  %p1497_p8 = por %p1496_p7, %p1495_p4 }
  0x5c   : > { %1136 = vmatprep.subr.mxu0 %v1570_v2  ;;  %1166 = vmatpush3.msra.mxu1 %v625_v37  ;;  %p1491_p13 = pneg %p1490_p12 }
  0x5d   : > { %1370 = vset.pattern.permute.xlu1 %v1573_v6  ;;  %1371 = vset.pattern.permute.xlu0 %v1574_v7 }
  0x5e   : > { %436 = vperm.xlu1 %1370, %v1771_v3   ;;  %443 = vperm.xlu0 %1371, %v1771_v3   ;;  %p1498_p11 = pnand %p1497_p8, %p1491_p13 }
  0x5f   : > { %1137 = vmatpush3.msra.mxu0 %v536_v19  ;;  %1167 = vmatprep.subr.mxu1 %v1570_v2 }
  0x60   : > { %1138 = vmatprep.subr.mxu0 %v1570_v2  ;;  %1168 = vmatpush3.msra.mxu1 %v624_v38  ;;  %v612_v38 = vld [vmem:[#allocation5] sm:$0xff] }
  0x61   : > { %1139 = vmatpush3.msra.mxu0 %v535_v21  ;;  %1169 = vmatprep.subr.mxu1 %v1570_v2 }
  0x62   : > { %1372 = vset.pattern.permute.xlu1 %v1575_v8  ;;  %1374 = vset.pattern.permute.xlu0 %v1576_v9 }
  0x63   : > { %450 = vperm.xlu1 %1372, %v1771_v3   ;;  %464 = vperm.xlu0 %1374, %v1771_v3  }
  0x64   : > { %1140 = vmatprep.subr.mxu0 %v1570_v2  ;;  %1170 = vmatpush3.msra.mxu1 %v623_v39  ;;  %v721_v39 = vld [vmem:[#allocation7 + $0x78] sm:$0xff] }
  0x65   : > { %1141 = vmatpush3.msra.mxu0 %v534_v22  ;;  %1171 = vmatprep.subr.mxu1 %v1570_v2 }
  0x66   : > { %1142 = vmatprep.subr.mxu0 %v1570_v2  ;;  %1172 = vmatpush3.msra.mxu1 %v622_v40  ;;  %v720_v40 = vld [vmem:[#allocation7 + $0x70] sm:$0xff] }
  0x67   : > { %1373 = vset.pattern.permute.xlu1 %v1577_v12  ;;  %1377 = vset.pattern.permute.xlu0 %v1578_v13 }
  0x68   : > { %457 = vperm.xlu1 %1373, %v1771_v3   ;;  %485 = vperm.xlu0 %1377, %v1771_v3  }
  0x69   : > { %1143 = vmatpush3.msra.mxu0 %v533_v24  ;;  %1173 = vmatprep.subr.mxu1 %v1570_v2 }
  0x6a   : > { %1144 = vmatprep.subr.mxu0 %v1570_v2  ;;  %1174 = vmatpush3.msra.mxu1 %v621_v41  ;;  %v719_v41 = vld [vmem:[#allocation7 + $0x68] sm:$0xff] }
  0x6b   : > { %1145 = vmatpush3.msra.mxu0 %v532_v25  ;;  %1175 = vmatprep.subr.mxu1 %v1570_v2 }
  0x6c   : > { %1375 = vset.pattern.permute.xlu1 %v1579_v15  ;;  %1380 = vset.pattern.permute.xlu0 %v1580_v16 }
  0x6d   : > { %471 = vperm.xlu1 %1375, %v1771_v3   ;;  %506 = vperm.xlu0 %1380, %v1771_v3  }
  0x6e   : > { %1146 = vmatprep.subr.mxu0 %v1570_v2  ;;  %1176 = vmatpush3.msra.mxu1 %v620_v42  ;;  %v718_v42 = vld [vmem:[#allocation7 + $0x60] sm:$0xff] }
  0x6f   : > { %1147 = vmatpush3.msra.mxu0 %v531_v26  ;;  %1177 = vmatprep.subr.mxu1 %v1570_v2 }
  0x70   : > { %1148 = vmatprep.subr.mxu0 %v1570_v2  ;;  %1178 = vmatpush3.msra.mxu1 %v619_v43  ;;  %v717_v43 = vld [vmem:[#allocation7 + $0x58] sm:$0xff] }
  0x71   : > { %1376 = vset.pattern.permute.xlu1 %v1581_v20  ;;  %1383 = vset.pattern.permute.xlu0 %v1569_v1 }
  0x72   : > { %478 = vperm.xlu1 %1376, %v1771_v3   ;;  %1149 = vmatpush3.msra.mxu0 %v530_v28 }
  0x73   : > { %1150 = vmatprep.subr.mxu0 %v1570_v2  ;;  %1179 = vmatprep.subr.mxu1 %v1570_v2 }
  0x74   : > { %1151 = vmatpush3.msra.mxu0 %v529_v29  ;;  %1180 = vmatpush3.msra.mxu1 %v618_v44  ;;  %v716_v44 = vld [vmem:[#allocation7 + $0x50] sm:$0xff] }
  0x75   : > { %1152 = vmatprep.subr.mxu0 %v1570_v2  ;;  %1181 = vmatprep.subr.mxu1 %v1570_v2 }
  0x76   : > { %1378 = vset.pattern.permute.xlu1 %v1582_v23  ;;  %1153 = vmatpush3.msra.mxu0 %v528_v31 }
  0x77   : > { %492 = vperm.xlu1 %1378, %v1771_v3   ;;  %1154 = vmatprep.subr.mxu0 %v1570_v2 }
  0x78   : > { %1155 = vmatpush3.msra.mxu0 %v527_v32  ;;  %1182 = vmatpush3.msra.mxu1 %v617_v45  ;;  %v715_v45 = vld [vmem:[#allocation7 + $0x48] sm:$0xff] }
  0x79   : > { %1156 = vmatprep.subr.mxu0 %v1570_v2  ;;  %1183 = vmatprep.subr.mxu1 %v1570_v2 }
  0x7a   : > { %1157 = vmatpush3.msra.mxu0 %v526_v34  ;;  %1184 = vmatpush3.msra.mxu1 %v616_v46  ;;  %v714_v46 = vld [vmem:[#allocation7 + $0x40] sm:$0xff] }
  0x7b   : > { %1379 = vset.pattern.permute.xlu1 %v1583_v27  ;;  %1196 = vmatprep.subr.mxu0 %v1570_v2 }
  0x7c   : > { %499 = vperm.xlu1 %1379, %v1771_v3   ;;  %1185 = vmatprep.subr.mxu1 %v1570_v2 }
  0x7d   : > { %1186 = vmatpush3.msra.mxu1 %v615_v47  ;;  %v713_v47 = vld [vmem:[#allocation7 + $0x38] sm:$0xff] }
  0x7e   : > { %1187 = vmatprep.subr.mxu1 %v1570_v2 }
  0x7f   : > { %1188 = vmatpush3.msra.mxu1 %v614_v48  ;;  %v712_v48 = vld [vmem:[#allocation7 + $0x30] sm:$0xff] }
  0x80   : > { %1381 = vset.pattern.permute.xlu1 %v1584_v30  ;;  %1189 = vmatprep.subr.mxu1 %v1570_v2 }
  0x81   : > { %513 = vperm.xlu1 %1381, %v1771_v3   ;;  %1190 = vmatpush3.msra.mxu1 %v613_v49  ;;  %v711_v49 = vld [vmem:[#allocation7 + $0x28] sm:$0xff] }
  0x82   : > { %1191 = vmatprep.subr.mxu1 %v1570_v2 }
  0x83   : > { %1192 = vmatpush3.msra.mxu1 %v612_v38 }
  0x84   : > { %1231 = vmatprep.subr.mxu1 %v1570_v2 }
  0x85   : > { %1382 = vset.pattern.permute.xlu1 %v1569_v1 }
  0x86   : > { %522 = vperm.xlu1 %1382, %v519_v33  }
  0xcf   : > { %v423_v52 = vpop.permute.xlu1 %422  ;;  %v409_v53 = vpop.permute.xlu0 %408 }
  0xd0   : > { %vm410_vm1 = vcmp.eq.s32.totalorder %v409_v53, %v1831_v51  ;;  %vm424_vm2 = vcmp.eq.s32.totalorder %v423_v52, %v1831_v51 }
  0xd1   : > { %v1035_v54 = vsel %vm410_vm1, 1.0, %v1570_v2  ;;  %v1037_v59 = vsel %vm424_vm2, 1.0, %v1570_v2 }
  0xd4   : > { %v430_v55 = vpop.permute.xlu1 %429  ;;  %v416_v56 = vpop.permute.xlu0 %415 }
  0xd5   : > { %vm417_vm3 = vcmp.eq.s32.totalorder %v416_v56, %v1831_v51  ;;  %vm431_vm4 = vcmp.eq.s32.totalorder %v430_v55, %v1831_v51  ;;  %v707_v55 = vld [vmem:[#allocation7 + $0x8] sm:$0xff]  ;;  %v706_v56 = vld [vmem:[#allocation7] sm:$0xff] }
  0xd6   : > { %v1036_v57 = vsel %vm417_vm3, 1.0, %v1570_v2  ;;  %v1038_v63 = vsel %vm431_vm4, 1.0, %v1570_v2 }
  0xd7   : > { %v420_v58 = vadd.f32 %v1036_v57, %v1035_v54  ;;  %v708_v54 = vld [vmem:[#allocation7 + $0x10] sm:$0xff]  ;;  %v815_v57 = vld [vmem:[#allocation8 + $0x78] sm:$0xff] }
  0xd9   : > { %v427_v60 = vadd.f32 %v1037_v59, %v420_v58  ;;  %v437_v61 = vpop.permute.xlu1 %436  ;;  %v444_v62 = vpop.permute.xlu0 %443  ;;  %v814_v58 = vld [vmem:[#allocation8 + $0x70] sm:$0xff]  ;;  %v813_v59 = vld [vmem:[#allocation8 + $0x68] sm:$0xff] }
  0xda   : > { %vm438_vm5 = vcmp.eq.s32.totalorder %v437_v61, %v1831_v51  ;;  %vm445_vm6 = vcmp.eq.s32.totalorder %v444_v62, %v1831_v51  ;;  %v811_v61 = vld [vmem:[#allocation8 + $0x58] sm:$0xff]  ;;  %v810_v62 = vld [vmem:[#allocation8 + $0x50] sm:$0xff] }
  0xdb   : > { %v434_v0 = vadd.f32 %v1038_v63, %v427_v60  ;;  %v1039_v1 = vsel %vm438_vm5, 1.0, %v1570_v2  ;;  %v1040_v4 = vsel %vm445_vm6, 1.0, %v1570_v2  ;;  %v812_v60 = vld [vmem:[#allocation8 + $0x60] sm:$0xff]  ;;  %v809_v63 = vld [vmem:[#allocation8 + $0x48] sm:$0xff] }
  0xdd   : > { %v441_v3 = vadd.f32 %v1039_v1, %v434_v0  ;;  %v808_v0 = vld [vmem:[#allocation8 + $0x40] sm:$0xff]  ;;  %v807_v1 = vld [vmem:[#allocation8 + $0x38] sm:$0xff] }
  0xde   : > { %v451_v5 = vpop.permute.xlu1 %450  ;;  %v465_v8 = vpop.permute.xlu0 %464 }
  0xdf   : > { %vm452_vm7 = vcmp.eq.s32.totalorder %v451_v5, %v1831_v51  ;;  %v448_v6 = vadd.f32 %v1040_v4, %v441_v3  ;;  %vm466_vm9 = vcmp.eq.s32.totalorder %v465_v8, %v1831_v51  ;;  %v806_v3 = vld [vmem:[#allocation8 + $0x30] sm:$0xff]  ;;  %v805_v4 = vld [vmem:[#allocation8 + $0x28] sm:$0xff]  ;;  %v804_v5 = vld [vmem:[#allocation8 + $0x20] sm:$0xff] }
  0xe0   : > { %v1041_v7 = vsel %vm452_vm7, 1.0, %v1570_v2  ;;  %v1043_v13 = vsel %vm466_vm9, 1.0, %v1570_v2 }
  0xe1   : > { %v455_v10 = vadd.f32 %v1041_v7, %v448_v6  ;;  %v803_v6 = vld [vmem:[#allocation8 + $0x18] sm:$0xff]  ;;  %v1051_v7 = vld [vmem:[%s1953_s4] ss:$0 sm:$0xff] }
  0xe3   : > { %v458_v9 = vpop.permute.xlu1 %457  ;;  %v486_v17 = vpop.permute.xlu0 %485 }
  0xe4   : > { %vm459_vm8 = vcmp.eq.s32.totalorder %v458_v9, %v1831_v51  ;;  %vm487_vm12 = vcmp.eq.s32.totalorder %v486_v17, %v1831_v51 }
  0xe5   : > { %v1042_v11 = vsel %vm459_vm8, 1.0, %v1570_v2  ;;  %v1046_v22 = vsel %vm487_vm12, 1.0, %v1570_v2 }
  0xe6   : > { %v462_v12 = vadd.f32 %v1042_v11, %v455_v10 }
  0xe8   : > { %v472_v14 = vpop.permute.xlu1 %471  ;;  %v469_v15 = vadd.f32 %v1043_v13, %v462_v12  ;;  %v507_v24 = vpop.permute.xlu0 %506  ;;  %v802_v12 = vld [vmem:[#allocation8 + $0x10] sm:$0xff]  ;;  %v801_v13 = vld [vmem:[#allocation8 + $0x8] sm:$0xff] }
  0xe9   : > { %vm473_vm10 = vcmp.eq.s32.totalorder %v472_v14, %v1831_v51  ;;  %vm508_vm14 = vcmp.eq.s32.totalorder %v507_v24, %v1831_v51  ;;  %v800_v14 = vld [vmem:[#allocation8] sm:$0xff] }
  0xea   : > { %v1044_v16 = vsel %vm473_vm10, 1.0, %v1570_v2  ;;  %v1049_v30 = vsel %vm508_vm14, 1.0, %v1570_v2 }
  0xeb   : > { %v476_v19 = vadd.f32 %v1044_v16, %v469_v15  ;;  %v1052_v15 = vld [vmem:[%s1955_s6] ss:$0 sm:$0xff] }
  0xed   : > { %v479_v18 = vpop.permute.xlu1 %478 }
  0xee   : > { %vm480_vm11 = vcmp.eq.s32.totalorder %v479_v18, %v1831_v51 }
  0xef   : > { %v1045_v20 = vsel %vm480_vm11, 1.0, %v1570_v2 }
  0xf0   : > { %v483_v21 = vadd.f32 %v1045_v20, %v476_v19  ;;  %v1053_v20 = vld [vmem:[%s1957_s8] ss:$0 sm:$0xff] }
  0xf2   : > { %v493_v23 = vpop.permute.xlu1 %492  ;;  %v490_v25 = vadd.f32 %v1046_v22, %v483_v21 }
  0xf3   : > { %vm494_vm13 = vcmp.eq.s32.totalorder %v493_v23, %v1831_v51 }
  0xf4   : > { %v1047_v26 = vsel %vm494_vm13, 1.0, %v1570_v2 }
  0xf5   : > { %v497_v28 = vadd.f32 %v1047_v26, %v490_v25 }
  0xf7   : > { %v500_v27 = vpop.permute.xlu1 %499 }
  0xf8   : > { %vm501_vm15 = vcmp.eq.s32.totalorder %v500_v27, %v1831_v51 }
  0xf9   : > { %v1048_v29 = vsel %vm501_vm15, 1.0, %v1570_v2 }
  0xfa   : > { %v504_v31 = vadd.f32 %v1048_v29, %v497_v28 }
  0xfc   : > { %v511_v32 = vadd.f32 %v1049_v30, %v504_v31  ;;  %v514_v33 = vpop.permute.xlu1 %513 }
  0xfd   : > { %vm515_vm1 = vcmp.eq.s32.totalorder %v514_v33, %v1831_v51  ;;  %v709_v51 = vld [vmem:[#allocation7 + $0x18] sm:$0xff] }
  0xfe   : > { %v1050_v34 = vsel %vm515_vm1, 1.0, %v1570_v2 }
  0xff   : > { %v518_v35 = vadd.f32 %v1050_v34, %v511_v32 }
 0x101   : > { %v523_v36 = vpop.permute.xlu1 %522 }
 0x102   : > { %v525_v37 = vmul.f32 %v523_v36, %v518_v35 }
 0x104   : > { %1159 = vmatmul.mubr.f32.vlgmr.msra.gmra.mxu0 %v525_v37 }
 0x105   : > { %1228 = vmatprep.mubr.msk.f32.mxu0 %vm1585_vm0, %v1570_v2  ;;  %1197 = vmatpush3.msra.mxu0 %v721_v39 }
 0x106   : > { %1198 = vmatprep.subr.mxu0 %v1570_v2 }
 0x107   : > { %1199 = vmatpush3.msra.mxu0 %v720_v40 }
 0x108   : > { %1200 = vmatprep.subr.mxu0 %v1570_v2 }
 0x109   : > { %1201 = vmatpush3.msra.mxu0 %v719_v41 }
 0x10a   : > { %1202 = vmatprep.subr.mxu0 %v1570_v2 }
 0x10b   : > { %1203 = vmatpush3.msra.mxu0 %v718_v42 }
 0x10c   : > { %1204 = vmatprep.subr.mxu0 %v1570_v2 }
 0x10d   : > { %1205 = vmatpush3.msra.mxu0 %v717_v43 }
 0x10e   : > { %1206 = vmatprep.subr.mxu0 %v1570_v2 }
 0x10f   : > { %1207 = vmatpush3.msra.mxu0 %v716_v44 }
 0x110   : > { %1208 = vmatprep.subr.mxu0 %v1570_v2 }
 0x111   : > { %1209 = vmatpush3.msra.mxu0 %v715_v45 }
 0x112   : > { %1210 = vmatprep.subr.mxu0 %v1570_v2 }
 0x113   : > { %1211 = vmatpush3.msra.mxu0 %v714_v46 }
 0x114   : > { %1212 = vmatprep.subr.mxu0 %v1570_v2 }
 0x115   : > { %1213 = vmatpush3.msra.mxu0 %v713_v47 }
 0x116   : > { %1214 = vmatprep.subr.mxu0 %v1570_v2 }
 0x117   : > { %1215 = vmatpush3.msra.mxu0 %v712_v48 }
 0x118   : > { %1216 = vmatprep.subr.mxu0 %v1570_v2 }
 0x119   : > { %1217 = vmatpush3.msra.mxu0 %v711_v49 }
 0x11a   : > { %1218 = vmatprep.subr.mxu0 %v1570_v2 }
 0x11b   : > { %1219 = vmatpush3.msra.mxu0 %v710_v50 }
 0x11c   : > { %1220 = vmatprep.subr.mxu0 %v1570_v2 }
 0x11d   : > { %1221 = vmatpush3.msra.mxu0 %v709_v51 }
 0x11e   : > { %1222 = vmatprep.subr.mxu0 %v1570_v2 }
 0x11f   : > { %1223 = vmatpush3.msra.mxu0 %v708_v54 }
 0x120   : > { %1224 = vmatprep.subr.mxu0 %v1570_v2 }
 0x121   : > { %1225 = vmatpush3.msra.mxu0 %v707_v55 }
 0x122   : > { %1226 = vmatprep.subr.mxu0 %v1570_v2 }
 0x123   : > { %1227 = vmatpush3.msra.mxu0 %v706_v56 }
 0x1c4   : > { %v608_v52 = vpop.f32.mrf.mxu0 }
 0x1c5   : > { %1194 = vmatmul.mubr.f32.vlgmr.msra.gmra.mxu1 %v608_v52 }
 0x1c6   : > { %v1160_v53 = vpop.f32.mrf.mxu0  ;;  %1263 = vmatprep.mubr.msk.f32.mxu1 %vm1585_vm0, %v1570_v2  ;;  %1232 = vmatpush3.msra.mxu1 %v815_v57 }
 0x1c7   : > { %1233 = vmatprep.subr.mxu1 %v1570_v2 }
 0x1c8   : > { %1234 = vmatpush3.msra.mxu1 %v814_v58 }
 0x1c9   : > { %1235 = vmatprep.subr.mxu1 %v1570_v2 }
 0x1ca   : > { %1236 = vmatpush3.msra.mxu1 %v813_v59 }
 0x1cb   : > { %1237 = vmatprep.subr.mxu1 %v1570_v2 }
 0x1cc   : > { %1238 = vmatpush3.msra.mxu1 %v812_v60 }
 0x1cd   : > { %1239 = vmatprep.subr.mxu1 %v1570_v2 }
 0x1ce   : > { %1240 = vmatpush3.msra.mxu1 %v811_v61 }
 0x1cf   : > { %1241 = vmatprep.subr.mxu1 %v1570_v2 }
 0x1d0   : > { %1242 = vmatpush3.msra.mxu1 %v810_v62 }
 0x1d1   : > { %1243 = vmatprep.subr.mxu1 %v1570_v2 }
 0x1d2   : > { %1244 = vmatpush3.msra.mxu1 %v809_v63 }
 0x1d3   : > { %1245 = vmatprep.subr.mxu1 %v1570_v2 }
 0x1d4   : > { %1246 = vmatpush3.msra.mxu1 %v808_v0 }
 0x1d5   : > { %1247 = vmatprep.subr.mxu1 %v1570_v2 }
 0x1d6   : > { %1248 = vmatpush3.msra.mxu1 %v807_v1 }
 0x1d7   : > { %1249 = vmatprep.subr.mxu1 %v1570_v2 }
 0x1d8   : > { %1250 = vmatpush3.msra.mxu1 %v806_v3 }
 0x1d9   : > { %1251 = vmatprep.subr.mxu1 %v1570_v2 }
 0x1da   : > { %1252 = vmatpush3.msra.mxu1 %v805_v4 }
 0x1db   : > { %1253 = vmatprep.subr.mxu1 %v1570_v2 }
 0x1dc   : > { %1254 = vmatpush3.msra.mxu1 %v804_v5 }
 0x1dd   : > { %1255 = vmatprep.subr.mxu1 %v1570_v2 }
 0x1de   : > { %1256 = vmatpush3.msra.mxu1 %v803_v6 }
 0x1df   : > { %1257 = vmatprep.subr.mxu1 %v1570_v2 }
 0x1e0   : > { %1258 = vmatpush3.msra.mxu1 %v802_v12 }
 0x1e1   : > { %1259 = vmatprep.subr.mxu1 %v1570_v2 }
 0x1e2   : > { %1260 = vmatpush3.msra.mxu1 %v801_v13 }
 0x1e3   : > { %1261 = vmatprep.subr.mxu1 %v1570_v2 }
 0x1e4   : > { %1262 = vmatpush3.msra.mxu1 %v800_v14 }
 0x285   : > { %v701_v8 = vpop.f32.mrf.mxu1 }
 0x286   : > { %v702_v9 = vadd.f32 %v1051_v7, %v701_v8 }
 0x287   : > { %v1195_v10 = vpop.f32.mrf.mxu1 }
 0x288   : > { %v705_v11 = vmax.f32 %v702_v9, 0.0 }
 0x28a   : > { %1229 = vmatmul.mubr.f32.vlgmr.msra.gmra.mxu0 %v705_v11 }
 0x34a   : > { %v795_v16 = vpop.f32.mrf.mxu0 }
 0x34b   : > { %v796_v17 = vadd.f32 %v1052_v15, %v795_v16 }
 0x34c   : > { %v1230_v18 = vpop.f32.mrf.mxu0 }
 0x34d   : > { %v799_v19 = vmax.f32 %v796_v17, 0.0 }
 0x34f   : > { %1264 = vmatmul.mubr.f32.vlgmr.msra.gmra.mxu1 %v799_v19 }
 0x40f   : > { %v889_v2 = vpop.f32.mrf.mxu1 }
 0x410   : > { %v890_v21 = vadd.f32 %v1053_v20, %v889_v2 }
 0x411   : > { %v1265_v22 = vpop.f32.mrf.mxu1 }
 0x412   : > { %893 = vst [vmem:[%s395_s17] sm:$0xff] %v890_v21 }
 0x413   : > { %1501 = shalt.err (!%p1498_p11)
}
 0x414   : > { %s1502_s16 = scalar_lea.hbm %s1914_s27, 128  ;;  %s1506_s17 = scalar_lea.hbm %s1958_s9, 256 }
 0x415   : > { %p1503_p0 = scmp.ne.s32.totalorder %s1914_s27, %s1502_s16  ;;  %p1507_p3 = scmp.lt.s32.totalorder %s1914_s27, %s1958_s9 }
 0x416   : > { %p1508_p10 = scmp.lt.s32.totalorder %s1506_s17, %s1502_s16 }
 0x417   : > { %p1504_p2 = pnand %p1503_p0, %p1675_p5 }
 0x418   : > { %p1509_p9 = por %p1508_p10, %p1507_p3 }
 0x419   : > { %p1505_p1 = pneg %p1504_p2 }
 0x41b   : > { %p1510_p12 = pnand %p1509_p9, %p1505_p1 }
 0x41d   : > { %1513 = shalt.err (!%p1510_p12)
}
 0x41e   : > { %1282 = dma.vmem_to_hbm [thread:$0]  (%p1675_p5), %s909_s22, 128, %s1914_s27, %s895_s28  }
 0x41f PF: > { %p1309_p13 = scmp.ge.s32.totalorder %s1560_s12, 2  ;;  %s920_s29 = sand.u32 1, %s1548_s30  }
 0x420   : > { %s921_s14 = scalar_lea.sflag [#allocation4], %s920_s29 }
 0x421   : > { %p1298_p4 = pnand %p1309_p13, %p1679_p6 }
 0x423   : > { %p1299_p7 = pneg %p1298_p4 }
 0x425   : > { %1543 = dma.done.wait (%p1299_p7), %s921_s14, 128  }
 0x426   : > { %1545 = vsyncadd (%p1299_p7), %s921_s14, 4294967168  ;;  %p22_p8 = scmp.ge.s32.totalorder %s1662_s15, 4   ;;  %s1963_s30 = smov %s1552_s10 }
 0x427   : > { %s1964_s10 = smov %s1556_s11  ;;  %s1965_s11 = smov %s1673_s18 }
 0x428   : > { %s1966_s12 = smov %s1662_s15  ;;  %24 = sbr.rel (!%p22_p8) target bundleno = 6 (0x6), region = 111 }
 0x42d   :  { %926 = vsyncpa [#allocation3], 1 }
 0x42e   :  { %928 = vsyncpa [#allocation3 + $0x1], 1 }
 0x42f   :  { %929 = vsyncpa [#allocation6], 1 }
 0x430   :  { %930 = vsyncpa [#allocation9], 1 }
 0x431   :  { %931 = vsyncpa [#allocation4], 1 }
 0x432   :  { %933 = vsyncpa [#allocation4 + $0x1], 1 }

</bundles_post_ra>
